<compile_context>
chip_gen: v7x
topology: tpu7x:2x2x1
jax: 0.10.0
libtpu: 0.0.40
codegen_flags: <defaults>
</compile_context>

<pallas_src>
import jax
import jax.numpy as jnp
from jax.experimental import pallas as pl
from jax.experimental.pallas import tpu as pltpu


def _round_up(x, m):
    return (x + m - 1) // m * m


def _mlp_kernel(x_ref, w1_ref, b1_ref, w2_ref, b2_ref, o_ref):
    """One batch tile of: Linear -> ReLU -> Linear(H, 1)."""
    # Layer 1: x @ W1 on the MXU (bf16 inputs, f32 accumulation); bias + ReLU
    # stay in f32 on the VPU.
    h = jnp.dot(x_ref[...], w1_ref[...], preferred_element_type=jnp.float32)
    h = jnp.maximum(h + b1_ref[...], 0.0)

    # Layer 2 (single output unit): VPU multiply + XLU lane reduction against
    # the w2 row; avoids an f32->bf16 recast of h and a 128-wide padded matmul.
    out = jnp.sum(h * w2_ref[...], axis=-1, keepdims=True) + b2_ref[...]
    o_ref[...] = out.astype(o_ref.dtype)


def prepare_params(params, compute_dtype=jnp.bfloat16):
    """One-time weight prep (transpose / cast). Call ONCE, reuse every forward.

    params: ((W1, b1), (W2, b2)) in PyTorch nn.Linear layout:
            W (out_features, in_features), b (out_features,).
    """
    (w1, b1), (w2, b2) = params
    hidden, input_dim = w1.shape
    num_classes = w2.shape[0]
    assert w2.shape == (num_classes, hidden)
    assert num_classes == 1, "MLP module has a single output unit"

    w1t = jnp.asarray(w1).T.astype(compute_dtype)                    # (in, hidden) bf16
    b1r = jnp.asarray(b1).reshape(1, hidden).astype(jnp.float32)      # (1, hidden)
    w2r = jnp.asarray(w2).reshape(1, hidden).astype(jnp.float32)      # (1, hidden)
    b2r = jnp.asarray(b2).reshape(1, 1).astype(jnp.float32)           # (1, 1)
    return (w1t, b1r, w2r, b2r)


def mlp_forward(x, prepared, *, batch_tile=1024):
    """Fused MLP forward. x: (B, input_dim) f32 (or bf16). Returns (B, 1) f32."""
    w1t, b1r, w2r, b2r = prepared
    B, input_dim = x.shape
    assert w1t.shape[0] == input_dim
    hidden = w1t.shape[1]
    num_classes = 1
    cdt = w1t.dtype

    # Batch tile: sublane-aligned, as large as allowed (single maximal tile on
    # single-TC parts; caller picks batch_tile so Bp//tb >= 2 on v7x).
    tb = _round_up(min(batch_tile, _round_up(B, 8)), 8)
    Bp = _round_up(B, tb)

    # Cast x to the MXU input dtype up front (fused with batch padding if any).
    if Bp != B:
        xp = jnp.zeros((Bp, input_dim), cdt).at[:B].set(x.astype(cdt))
    else:
        xp = x.astype(cdt)

    grid = (Bp // tb,)

    # VMEM budget derived from actual (tile-padded, double-buffered) buffers.
    def pad_tile(r, c, itemsize):
        sub = 16 if itemsize == 2 else 8
        return _round_up(r, sub) * _round_up(c, 128) * itemsize

    per_step = (pad_tile(tb, input_dim, 2)        # x tile (bf16)
                + pad_tile(input_dim, hidden, 2)  # W1 (bf16)
                + pad_tile(1, hidden, 4)          # b1
                + pad_tile(1, hidden, 4)          # w2 row
                + pad_tile(1, 1, 4)               # b2
                + pad_tile(tb, num_classes, 4))   # output tile
    vmem_limit = min(max(4 * per_step + (4 << 20), 16 << 20), 64 << 20)

    flops = 2 * Bp * input_dim * hidden + 2 * Bp * hidden * num_classes
    bytes_accessed = (xp.size * xp.dtype.itemsize
                      + w1t.size * w1t.dtype.itemsize
                      + (b1r.size + w2r.size + b2r.size) * 4
                      + Bp * num_classes * 4)

    out = pl.pallas_call(
        _mlp_kernel,
        out_shape=jax.ShapeDtypeStruct((Bp, num_classes), jnp.float32),
        grid_spec=pl.GridSpec(
            grid=grid,
            in_specs=[
                pl.BlockSpec((tb, input_dim), lambda i: (i, 0)),      # x tile
                pl.BlockSpec((input_dim, hidden), lambda i: (0, 0)),  # W1 (resident)
                pl.BlockSpec((1, hidden), lambda i: (0, 0)),          # b1 (resident)
                pl.BlockSpec((1, hidden), lambda i: (0, 0)),          # w2 row (resident)
                pl.BlockSpec((1, 1), lambda i: (0, 0)),               # b2 (resident)
            ],
            out_specs=pl.BlockSpec((tb, num_classes), lambda i: (i, 0)),
        ),
        compiler_params=pltpu.CompilerParams(
            dimension_semantics=("parallel",),
            vmem_limit_bytes=vmem_limit,
        ),
        cost_estimate=pl.CostEstimate(
            flops=flops, transcendentals=0, bytes_accessed=bytes_accessed),
    )(xp, w1t, b1r, w2r, b2r)

    return out if Bp == B else out[:B]


def mlp_reference(x, params):
    """Pure-JAX f32 reference of the same forward (PyTorch layout weights)."""
    (w1, b1), (w2, b2) = params
    h = jnp.maximum(x @ w1.T + b1, 0.0)
    return h @ w2.T + b2


if __name__ == "__main__":
    key = jax.random.PRNGKey(0)

    # Module defaults: input_dim=100, hidden_layer_size=100, single output unit.
    batch = 200            # not a tile multiple -> exercises batch padding
    input_dim = 100
    hidden = 100
    num_classes = 1

    key, kx, kw1, kb1, kw2, kb2 = jax.random.split(key, 6)
    x = jax.random.normal(kx, (batch, input_dim), jnp.float32)

    # nn.Linear default init: U(-1/sqrt(fan_in), 1/sqrt(fan_in)), W is (out, in).
    bound1 = 1.0 / (input_dim ** 0.5)
    w1 = jax.random.uniform(kw1, (hidden, input_dim), jnp.float32, -bound1, bound1)
    b1 = jax.random.uniform(kb1, (hidden,), jnp.float32, -bound1, bound1)
    bound2 = 1.0 / (hidden ** 0.5)
    w2 = jax.random.uniform(kw2, (num_classes, hidden), jnp.float32, -bound2, bound2)
    b2 = jax.random.uniform(kb2, (num_classes,), jnp.float32, -bound2, bound2)
    params = ((w1, b1), (w2, b2))

    # One-time weight prep (hoisted out of the per-call path).
    prepared = prepare_params(params)

    # batch_tile=128 -> padded grid of 2 "parallel" batch tiles (both v7x TCs busy).
    fwd = jax.jit(lambda xx: mlp_forward(xx, prepared, batch_tile=128))
    out = jax.block_until_ready(fwd(x))

    ref = mlp_reference(x, params)
    assert out.shape == (batch, num_classes), out.shape
    # bf16 MXU inputs with f32 accumulation (layer 2 fully in f32): small tolerance.
    max_err = float(jnp.max(jnp.abs(out - ref)))
    assert max_err < 5e-2, f"mismatch vs reference: max abs err {max_err}"

    print("KERNEL_OK")
</pallas_src>

<mosaic_0001>
module attributes {stable_mosaic.version = 11 : i64} {
  func.func @_mlp_kernel(%arg0: i32, %arg1: memref<128x100xbf16, #tpu.memory_space<vmem>>, %arg2: memref<100x100xbf16, #tpu.memory_space<vmem>>, %arg3: memref<1x100xf32, #tpu.memory_space<vmem>>, %arg4: memref<1x100xf32, #tpu.memory_space<vmem>>, %arg5: memref<1x1xf32, #tpu.memory_space<vmem>>, %arg6: memref<128x1xf32, #tpu.memory_space<vmem>>) attributes {dimension_semantics = [#tpu.dimension_semantics<parallel>], iteration_bounds = array<i64: 2>, scalar_prefetch = 0 : i64, scratch_operands = 0 : i64, tpu.core_type = #tpu.core_type<tc>, window_params = [{transform_indices = @transform_0, window_bounds = array<i64: 128, 100>}, {pipeline_mode = #tpu.pipeline_mode<synchronous>, transform_indices = @transform_1, window_bounds = array<i64: 100, 100>}, {pipeline_mode = #tpu.pipeline_mode<synchronous>, transform_indices = @transform_2, window_bounds = array<i64: 1, 100>}, {pipeline_mode = #tpu.pipeline_mode<synchronous>, transform_indices = @transform_3, window_bounds = array<i64: 1, 100>}, {pipeline_mode = #tpu.pipeline_mode<synchronous>, transform_indices = @transform_4, window_bounds = array<i64: 1, 1>}, {transform_indices = @transform_5, window_bounds = array<i64: 128, 1>}]} {
    %c0 = arith.constant 0 : index
    %c0_0 = arith.constant 0 : index
    %0 = vector.load %arg1[%c0, %c0_0] : memref<128x100xbf16, #tpu.memory_space<vmem>>, vector<128x100xbf16>
    %c0_1 = arith.constant 0 : index
    %c0_2 = arith.constant 0 : index
    %1 = vector.load %arg2[%c0_1, %c0_2] : memref<100x100xbf16, #tpu.memory_space<vmem>>, vector<100x100xbf16>
    %cst = arith.constant dense<0.000000e+00> : vector<128x100xf32>
    %2 = tpu.matmul %0, %1, %cst {dimension_numbers = #tpu.dot_dimension_numbers<[1], [0], [0], [1], [0, 0, 1, 1], [], []>} : vector<128x100xbf16>, vector<100x100xbf16>, vector<128x100xf32> -> vector<128x100xf32>
    %c0_3 = arith.constant 0 : index
    %c0_4 = arith.constant 0 : index
    %3 = vector.load %arg3[%c0_3, %c0_4] : memref<1x100xf32, #tpu.memory_space<vmem>>, vector<1x100xf32>
    %4 = vector.broadcast %3 : vector<1x100xf32> to vector<128x100xf32>
    %5 = arith.addf %2, %4 : vector<128x100xf32>
    %cst_5 = arith.constant 0.000000e+00 : f32
    %6 = vector.broadcast %cst_5 : f32 to vector<128x100xf32>
    %7 = arith.maximumf %5, %6 : vector<128x100xf32>
    %c0_6 = arith.constant 0 : index
    %c0_7 = arith.constant 0 : index
    %8 = vector.load %arg4[%c0_6, %c0_7] : memref<1x100xf32, #tpu.memory_space<vmem>>, vector<1x100xf32>
    %9 = vector.broadcast %8 : vector<1x100xf32> to vector<128x100xf32>
    %10 = arith.mulf %7, %9 : vector<128x100xf32>
    %cst_8 = arith.constant dense<0.000000e+00> : vector<128xf32>
    %11 = vector.multi_reduction <add>, %10, %cst_8 [1] : vector<128x100xf32> to vector<128xf32>
    %12 = vector.shape_cast %11 : vector<128xf32> to vector<128x1xf32>
    %c0_9 = arith.constant 0 : index
    %c0_10 = arith.constant 0 : index
    %13 = vector.load %arg5[%c0_9, %c0_10] : memref<1x1xf32, #tpu.memory_space<vmem>>, vector<1x1xf32>
    %14 = vector.broadcast %13 : vector<1x1xf32> to vector<128x1xf32>
    %15 = arith.addf %12, %14 : vector<128x1xf32>
    %c0_11 = arith.constant 0 : index
    %c0_12 = arith.constant 0 : index
    %16 = vector.load %arg6[%c0_11, %c0_12] : memref<128x1xf32, #tpu.memory_space<vmem>>, vector<128x1xf32>
    tpu.vector_store %arg6[%c0_11, %c0_12], %15 {strides = array<i32>} : memref<128x1xf32, #tpu.memory_space<vmem>>, vector<128x1xf32>,
    return
  }
  func.func @transform_0(%arg0: i32) -> (i32, i32) {
    %c0_i32 = arith.constant 0 : i32
    %c0_i32_0 = arith.constant 0 : i32
    return %arg0, %c0_i32 : i32, i32
  }
  func.func @transform_1(%arg0: i32) -> (i32, i32) {
    %c0_i32 = arith.constant 0 : i32
    %c0_i32_0 = arith.constant 0 : i32
    %c0_i32_1 = arith.constant 0 : i32
    return %c0_i32, %c0_i32_0 : i32, i32
  }
  func.func @transform_2(%arg0: i32) -> (i32, i32) {
    %c0_i32 = arith.constant 0 : i32
    %c0_i32_0 = arith.constant 0 : i32
    %c0_i32_1 = arith.constant 0 : i32
    return %c0_i32, %c0_i32_0 : i32, i32
  }
  func.func @transform_3(%arg0: i32) -> (i32, i32) {
    %c0_i32 = arith.constant 0 : i32
    %c0_i32_0 = arith.constant 0 : i32
    %c0_i32_1 = arith.constant 0 : i32
    return %c0_i32, %c0_i32_0 : i32, i32
  }
  func.func @transform_4(%arg0: i32) -> (i32, i32) {
    %c0_i32 = arith.constant 0 : i32
    %c0_i32_0 = arith.constant 0 : i32
    %c0_i32_1 = arith.constant 0 : i32
    return %c0_i32, %c0_i32_0 : i32, i32
  }
  func.func @transform_5(%arg0: i32) -> (i32, i32) {
    %c0_i32 = arith.constant 0 : i32
    %c0_i32_0 = arith.constant 0 : i32
    return %arg0, %c0_i32 : i32, i32
  }
}

</mosaic_0001>

<bundles_post_ra>
// kernel: _lambda_.1
= control target key start
LH: loop header
LB: loop body
LE: loop exit
PB: predicated region body
PF: predicated region fallthrough
CT: control target
= control target key end

     0   :  { %s817_s20 = smov 0   ;;  %s969_s0 = inlined_call_operand.vmem [shape: bf16[256,100], index: 0, kind: input, shape index: {}]   ;;  %s970_s1 = inlined_call_operand.vmem [shape: bf16[100,100], index: 1, kind: input, shape index: {}]   ;;  %s971_s2 = inlined_call_operand.vmem [shape: f32[1,100], index: 2, kind: input, shape index: {}]   ;;  %s972_s3 = inlined_call_operand.vmem [shape: f32[1,100], index: 3, kind: input, shape index: {}]   ;;  %s973_s4 = inlined_call_operand.<no memory space> [shape: f32[1,1], index: 4, kind: input, shape index: {}]   ;;  %s974_s5 = inlined_call_operand.vmem [shape: f32[256,1], index: 5, kind: output, shape index: {}]  }
   0x1   :  { %v10_v0 = vstv %s973_s4 }
   0x2   :  { %11 = vst [vmem:[#allocation2] sm:$0x1] %v10_v0 }
   0x3 LB: > { %s655_s21 = sadd.s32 4294967295, %s782_s20   ;;  %p659_p0 = scmp.ge.s32.totalorder %s782_s20, 1  ;;  %s782_s20 = sphi %s817_s20, %s17_s20  }
   0x4   : > { %p190_p1 = scmp.lt.s32.totalorder %s782_s20, 3 }
   0x6   : > { %p191_p2 = pnand %p659_p0, %p190_p1 }
   0x7   : > { %v761_v1 = vld [vmem:[%s970_s1] sm:$0xff] (!%p191_p2)   ;;  %v762_v2 = vld [vmem:[%s970_s1 + $0x8] sm:$0xff] (!%p191_p2)   ;;  %s660_s25 = sshll.u32 (!%p191_p2), %s655_s21, 4  ;;  %v763_v3 = vld [vmem:[%s970_s1 + $0x10] sm:$0xff] (!%p191_p2)   ;;  %vm346_vm0 = vcmask (!%p191_p2), 818176   ;;  %vm371_vm1 = vcmask (!%p191_p2), 1041408  }
   0x8   : > { %194 = sbr.rel (%p191_p2) target bundleno = 428 (0x1ac), region = 40  ;;  %707 = vmatprep.subr.bf16.mxu0 (!%p191_p2), %v761_v1  ;;  %737 = vmatprep.subr.bf16.mxu1 (!%p191_p2), %v761_v1  ;;  %p219_p3 = scmp.lt.s32.totalorder (!%p191_p2), %s660_s25, 31  ;;  %v764_v4 = vld [vmem:[%s970_s1 + $0x18] sm:$0xff] (!%p191_p2)   ;;  %v765_v7 = vld [vmem:[%s970_s1 + $0x20] sm:$0xff] (!%p191_p2)   ;;  %v766_v8 = vld [vmem:[%s970_s1 + $0x28] sm:$0xff] (!%p191_p2)   ;;  %vm582_vm2 = vcmask (!%p191_p2), 7168  }
   0x9   : > { %708 = vmatpush3.bf16.msra.mxu0 (!%p191_p2), %v761_v1  ;;  %744 = vmatpush3.bf16.msra.mxu1 (!%p191_p2), %v761_v1  ;;  %v767_v9 = vld [vmem:[%s970_s1 + $0x30] ss:$0 sps:$4 sm:$0x33] (!%p191_p2)   ;;  %v873_v17 = vld [vmem:[%s971_s2] ss:$0 sm:$0xff] (!%p191_p2) }
   0xa   : > { %709 = vmatprep.subr.bf16.mxu0 (!%p191_p2), %v762_v2  ;;  %738 = vmatprep.subr.bf16.mxu1 (!%p191_p2), %v762_v2  ;;  %v373_v10 = vsel (!%p191_p2), %vm371_vm1, %v767_v9, 0  ;;  %v882_v28 = vld [vmem:[%s972_s3] ss:$0 sm:$0xff] (!%p191_p2) }
   0xd   : > { %710 = vmatpush3.bf16.msra.mxu0 (!%p191_p2), %v762_v2  ;;  %745 = vmatpush3.bf16.msra.mxu1 (!%p191_p2), %v762_v2 }
   0xe   : > { %711 = vmatprep.subr.bf16.mxu0 (!%p191_p2), %v763_v3  ;;  %739 = vmatprep.subr.bf16.mxu1 (!%p191_p2), %v763_v3 }
   0xf   : > { %s976_s25 = smov (!%p219_p3, %s660_s25), 31 }
  0x10   : > { %s661_s28 = sshll.u32 %s976_s25, 2  ;;  %s663_s19 = sshll.u32 %s976_s25, 3 }
  0x11   : > { %s843_s8 = scalar_lea.vmem %s969_s0, %s661_s28  ;;  %712 = vmatpush3.bf16.msra.mxu0 %v763_v3  ;;  %746 = vmatpush3.bf16.msra.mxu1 %v763_v3  ;;  %s932_s23 = scalar_lea.vmem %s974_s5, %s663_s19 }
  0x12   : > { %v768_v5 = vld [vmem:[%s843_s8] sm:$0xff]   ;;  %713 = vmatprep.subr.bf16.mxu0 %v764_v4  ;;  %740 = vmatprep.subr.bf16.mxu1 %v764_v4  ;;  %v770_v11 = vld [vmem:[%s843_s8 + $0x8] sm:$0xff]   ;;  %v772_v13 = vld [vmem:[%s843_s8 + $0x10] sm:$0xff]  }
  0x13   : > { %v769_v6 = vld [vmem:[%s843_s8 + $0x20] sm:$0xff]   ;;  %721 = vmatprep.mubr.msk.bf16.mxu0 %vm346_vm0, %v768_v5  ;;  %v771_v12 = vld [vmem:[%s843_s8 + $0x28] sm:$0xff]   ;;  %v774_v14 = vld [vmem:[%s843_s8 + $0x30] sm:$0xff]  }
  0x14   : > { %729 = vmatprep.mubr.msk.bf16.mxu1 %vm346_vm0, %v769_v6  ;;  %v773_v15 = vld [vmem:[%s843_s8 + $0x18] sm:$0xff]  }
  0x15   : > { %714 = vmatpush3.bf16.msra.mxu0 %v764_v4  ;;  %747 = vmatpush3.bf16.msra.mxu1 %v764_v4  ;;  %v775_v16 = vld [vmem:[%s843_s8 + $0x38] sm:$0xff]  }
  0x16   : > { %715 = vmatprep.subr.bf16.mxu0 %v765_v7  ;;  %741 = vmatprep.subr.bf16.mxu1 %v765_v7 }
  0x19   : > { %716 = vmatpush3.bf16.msra.mxu0 %v765_v7  ;;  %748 = vmatpush3.bf16.msra.mxu1 %v765_v7 }
  0x1a   : > { %717 = vmatprep.subr.bf16.mxu0 %v766_v8  ;;  %742 = vmatprep.subr.bf16.mxu1 %v766_v8 }
  0x1d   : > { %718 = vmatpush3.bf16.msra.mxu0 %v766_v8  ;;  %749 = vmatpush3.bf16.msra.mxu1 %v766_v8 }
  0x1e   : > { %751 = vmatprep.subr.msk.bf16.mxu0 %vm371_vm1, %v767_v9  ;;  %752 = vmatprep.subr.msk.bf16.mxu1 %vm371_vm1, %v767_v9 }
  0x21   : > { %720 = vmatpush3.bf16.msra.mxu0 %v373_v10  ;;  %750 = vmatpush3.bf16.msra.mxu1 %v373_v10 }
  0x24   : > { %722 = vmatmul.mubr.msk.bf16.vlgmr.msra.gmra.mrb[0].mxu0 %vm346_vm0, %v770_v11  ;;  %730 = vmatmul.mubr.msk.bf16.vlgmr.msra.gmra.mrb[0].mxu1 %vm346_vm0, %v771_v12 }
  0x25   : > { %725 = vmatprep.mubr.msk.bf16.mxu0 %vm346_vm0, %v772_v13  ;;  %733 = vmatprep.mubr.msk.bf16.mxu1 %vm346_vm0, %v774_v14 }
  0x2c   : > { %726 = vmatmul.mubr.msk.bf16.gmra.mrb[4].mxu0 %vm346_vm0, %v773_v15  ;;  %734 = vmatmul.mubr.msk.bf16.gmra.mrb[4].mxu1 %vm346_vm0, %v775_v16 }
  0xf7   : > { %v723_v18 = vpop.f32.mrb[0].mxu0  ;;  %v731_v19 = vpop.f32.mrb[0].mxu1 }
  0xf8   : > { %v418_v20 = vadd.f32 %v723_v18, %v873_v17  ;;  %v450_v21 = vadd.f32 %v731_v19, %v873_v17  ;;  %v409_v22 = vpop.f32.mrb[1].mxu0  ;;  %v441_v23 = vpop.f32.mrb[1].mxu1 }
  0xf9   : > { %v410_v24 = vadd.f32 %v873_v17, %v409_v22  ;;  %v442_v25 = vadd.f32 %v873_v17, %v441_v23  ;;  %v724_v26 = vpop.f32.mrb[2].mxu0  ;;  %v732_v27 = vpop.f32.mrb[2].mxu1 }
  0xfa   : > { %v474_v29 = vmax.f32 %v418_v20, 0.0  ;;  %v482_v30 = vmax.f32 %v450_v21, 0.0  ;;  %v421_v31 = vadd.f32 %v724_v26, %v873_v17  ;;  %v453_v32 = vadd.f32 %v732_v27, %v873_v17  ;;  %v412_v33 = vpop.f32.mrb[3].mxu0  ;;  %v444_v34 = vpop.f32.mrb[3].mxu1 }
  0xfb   : > { %v472_v35 = vmax.f32 %v410_v24, 0.0  ;;  %v480_v39 = vmax.f32 %v442_v25, 0.0  ;;  %v413_v41 = vadd.f32 %v873_v17, %v412_v33  ;;  %v445_v42 = vadd.f32 %v873_v17, %v444_v34 }
  0xfc   : > { %v475_v36 = vmax.f32 %v421_v31, 0.0  ;;  %v505_v37 = vmul.f32 %v882_v28, %v482_v30  ;;  %v497_v38 = vmul.f32 %v882_v28, %v474_v29  ;;  %v483_v40 = vmax.f32 %v453_v32, 0.0 }
  0xfd   : > { %v495_v46 = vmul.f32 %v882_v28, %v472_v35  ;;  %v473_v51 = vmax.f32 %v413_v41, 0.0  ;;  %v481_v52 = vmax.f32 %v445_v42, 0.0  ;;  %v503_v55 = vmul.f32 %v882_v28, %v480_v39 }
  0xfe   : > { %v541_v43 = vsel %vm346_vm0, %v505_v37, 0.0  ;;  %v517_v44 = vsel %vm346_vm0, %v497_v38, 0.0  ;;  %v498_v45 = vmul.f32 %v882_v28, %v475_v36  ;;  %v506_v54 = vmul.f32 %v882_v28, %v483_v40  ;;  %v689_v36 = vld [vmem:[#allocation2] ss:$0 sm:$0xff] }
  0xff   : > { %542 = vadd.xlane.f32.xlu0 %v541_v43  ;;  %518 = vadd.xlane.f32.xlu1 %v517_v44  ;;  %v727_v47 = vpop.f32.mrb[4].mxu0  ;;  %v735_v48 = vpop.f32.mrb[4].mxu1  ;;  %v511_v59 = vsel %vm346_vm0, %v495_v46, 0.0  ;;  %v535_v0 = vsel %vm346_vm0, %v503_v55, 0.0  ;;  %v504_v1 = vmul.f32 %v882_v28, %v481_v52  ;;  %v496_v2 = vmul.f32 %v882_v28, %v473_v51 }
 0x100   : > { %v425_v49 = vpop.f32.mrb[5].mxu0  ;;  %v457_v50 = vpop.f32.mrb[5].mxu1  ;;  %v434_v57 = vadd.f32 %v727_v47, %v873_v17  ;;  %v520_v58 = vsel %vm346_vm0, %v498_v45, 0.0  ;;  %v544_v63 = vsel %vm346_vm0, %v506_v54, 0.0  ;;  %v466_v15 = vadd.f32 %v735_v48, %v873_v17 }
 0x101   : > { %v728_v53 = vpop.f32.mrb[6].mxu0  ;;  %v736_v56 = vpop.f32.mrb[6].mxu1  ;;  %v426_v4 = vadd.f32 %v873_v17, %v425_v49  ;;  %v458_v7 = vadd.f32 %v873_v17, %v457_v50  ;;  %v538_v8 = vsel %vm346_vm0, %v504_v1, 0.0  ;;  %v514_v9 = vsel %vm346_vm0, %v496_v2, 0.0 }
 0x102   : > { %v437_v60 = vadd.f32 %v728_v53, %v873_v17  ;;  %v428_v61 = vpop.f32.mrb[7].mxu0  ;;  %v460_v62 = vpop.f32.mrb[7].mxu1  ;;  %v478_v3 = vmax.f32 %v434_v57, 0.0  ;;  %v469_v18 = vadd.f32 %v736_v56, %v873_v17  ;;  %v486_v24 = vmax.f32 %v466_v15, 0.0 }
 0x103   : > { %521 = vadd.xlane.f32.xlu1 %v520_v58  ;;  %512 = vadd.xlane.f32.xlu0 %v511_v59  ;;  %v429_v6 = vadd.f32 %v873_v17, %v428_v61  ;;  %v461_v10 = vadd.f32 %v873_v17, %v460_v62  ;;  %v476_v11 = vmax.f32 %v426_v4, 0.0  ;;  %v484_v16 = vmax.f32 %v458_v7, 0.0 }
 0x104   : > { %v479_v5 = vmax.f32 %v437_v60, 0.0  ;;  %v501_v14 = vmul.f32 %v882_v28, %v478_v3  ;;  %v487_v25 = vmax.f32 %v469_v18, 0.0  ;;  %v509_v33 = vmul.f32 %v882_v28, %v486_v24 }
 0x105   : > { %v477_v12 = vmax.f32 %v429_v6, 0.0  ;;  %v485_v19 = vmax.f32 %v461_v10, 0.0  ;;  %v499_v23 = vmul.f32 %v882_v28, %v476_v11  ;;  %v507_v29 = vmul.f32 %v882_v28, %v484_v16 }
 0x106   : > { %v502_v13 = vmul.f32 %v882_v28, %v479_v5  ;;  %v529_v21 = vsel %vm346_vm0, %v501_v14, 0.0  ;;  %v510_v32 = vmul.f32 %v882_v28, %v487_v25  ;;  %v553_v35 = vsel %vm346_vm0, %v509_v33, 0.0 }
 0x107   : > { %545 = vadd.xlane.f32.xlu1 %v544_v63  ;;  %536 = vadd.xlane.f32.xlu0 %v535_v0  ;;  %v500_v22 = vmul.f32 %v882_v28, %v477_v12  ;;  %v523_v27 = vsel %vm346_vm0, %v499_v23, 0.0  ;;  %v508_v17 = vmul.f32 %v882_v28, %v485_v19  ;;  %v547_v31 = vsel %vm346_vm0, %v507_v29, 0.0 }
 0x108   : > { %v532_v20 = vsel %vm346_vm0, %v502_v13, 0.0  ;;  %v556_v34 = vsel %vm346_vm0, %v510_v32, 0.0 }
 0x109   : > { %v526_v26 = vsel %vm346_vm0, %v500_v22, 0.0  ;;  %v550_v30 = vsel %vm346_vm0, %v508_v17, 0.0 }
 0x10b   : > { %539 = vadd.xlane.f32.xlu1 %v538_v8  ;;  %515 = vadd.xlane.f32.xlu0 %v514_v9 }
 0x10f   : > { %533 = vadd.xlane.f32.xlu1 %v532_v20  ;;  %530 = vadd.xlane.f32.xlu0 %v529_v21 }
 0x113   : > { %527 = vadd.xlane.f32.xlu1 %v526_v26  ;;  %524 = vadd.xlane.f32.xlu0 %v523_v27 }
 0x117   : > { %551 = vadd.xlane.f32.xlu1 %v550_v30  ;;  %548 = vadd.xlane.f32.xlu0 %v547_v31 }
 0x11b   : > { %557 = vadd.xlane.f32.xlu1 %v556_v34  ;;  %554 = vadd.xlane.f32.xlu0 %v553_v35 }
 0x18c   : > { %v543_v28 = vpop.xlane.xlu0 %542  ;;  %v519_v37 = vpop.xlane.xlu1 %518 }
 0x18d   : > { %v576_v38 = vadd.f32 %v689_v36, %v543_v28  ;;  %v568_v39 = vadd.f32 %v689_v36, %v519_v37 }
 0x18f   : > { %593 = vst.msk [vmem:[%s932_s23 + $0x50] sm:$0xff] %vm582_vm2, %v576_v38  ;;  %585 = vst.msk [vmem:[%s932_s23 + $0x10] sm:$0xff] %vm582_vm2, %v568_v39 }
 0x190   : > { %v522_v40 = vpop.xlane.xlu1 %521  ;;  %v513_v41 = vpop.xlane.xlu0 %512 }
 0x191   : > { %v569_v42 = vadd.f32 %v689_v36, %v522_v40  ;;  %v566_v43 = vadd.f32 %v689_v36, %v513_v41 }
 0x193   : > { %586 = vst.msk [vmem:[%s932_s23 + $0x18] sm:$0xff] %vm582_vm2, %v569_v42  ;;  %583 = vst.msk [vmem:[%s932_s23] sm:$0xff] %vm582_vm2, %v566_v43 }
 0x194   : > { %v546_v44 = vpop.xlane.xlu1 %545  ;;  %v537_v45 = vpop.xlane.xlu0 %536 }
 0x195   : > { %v577_v46 = vadd.f32 %v689_v36, %v546_v44  ;;  %v574_v47 = vadd.f32 %v689_v36, %v537_v45 }
 0x197   : > { %594 = vst.msk [vmem:[%s932_s23 + $0x58] sm:$0xff] %vm582_vm2, %v577_v46  ;;  %591 = vst.msk [vmem:[%s932_s23 + $0x40] sm:$0xff] %vm582_vm2, %v574_v47 }
 0x198   : > { %v540_v48 = vpop.xlane.xlu1 %539  ;;  %v516_v49 = vpop.xlane.xlu0 %515 }
 0x199   : > { %v575_v50 = vadd.f32 %v689_v36, %v540_v48  ;;  %v567_v51 = vadd.f32 %v689_v36, %v516_v49 }
 0x19b   : > { %592 = vst.msk [vmem:[%s932_s23 + $0x48] sm:$0xff] %vm582_vm2, %v575_v50  ;;  %584 = vst.msk [vmem:[%s932_s23 + $0x8] sm:$0xff] %vm582_vm2, %v567_v51 }
 0x19c   : > { %v534_v52 = vpop.xlane.xlu1 %533  ;;  %v531_v53 = vpop.xlane.xlu0 %530 }
 0x19d   : > { %v573_v54 = vadd.f32 %v689_v36, %v534_v52  ;;  %v572_v55 = vadd.f32 %v689_v36, %v531_v53 }
 0x19f   : > { %590 = vst.msk [vmem:[%s932_s23 + $0x38] sm:$0xff] %vm582_vm2, %v573_v54  ;;  %589 = vst.msk [vmem:[%s932_s23 + $0x30] sm:$0xff] %vm582_vm2, %v572_v55 }
 0x1a0   : > { %v528_v56 = vpop.xlane.xlu1 %527  ;;  %v525_v57 = vpop.xlane.xlu0 %524 }
 0x1a1   : > { %v571_v58 = vadd.f32 %v689_v36, %v528_v56  ;;  %v570_v59 = vadd.f32 %v689_v36, %v525_v57 }
 0x1a3   : > { %588 = vst.msk [vmem:[%s932_s23 + $0x28] sm:$0xff] %vm582_vm2, %v571_v58  ;;  %587 = vst.msk [vmem:[%s932_s23 + $0x20] sm:$0xff] %vm582_vm2, %v570_v59 }
 0x1a4   : > { %v552_v60 = vpop.xlane.xlu1 %551  ;;  %v549_v61 = vpop.xlane.xlu0 %548 }
 0x1a5   : > { %v579_v62 = vadd.f32 %v689_v36, %v552_v60  ;;  %v578_v63 = vadd.f32 %v689_v36, %v549_v61 }
 0x1a7   : > { %596 = vst.msk [vmem:[%s932_s23 + $0x68] sm:$0xff] %vm582_vm2, %v579_v62  ;;  %595 = vst.msk [vmem:[%s932_s23 + $0x60] sm:$0xff] %vm582_vm2, %v578_v63 }
 0x1a8   : > { %v558_v0 = vpop.xlane.xlu1 %557  ;;  %v555_v1 = vpop.xlane.xlu0 %554 }
 0x1a9   : > { %v581_v2 = vadd.f32 %v689_v36, %v558_v0  ;;  %v580_v3 = vadd.f32 %v689_v36, %v555_v1 }
 0x1ab   : > { %598 = vst.msk [vmem:[%s932_s23 + $0x78] sm:$0xff] %vm582_vm2, %v581_v2  ;;  %597 = vst.msk [vmem:[%s932_s23 + $0x70] sm:$0xff] %vm582_vm2, %v580_v3 }
 0x1ac PF: > { %s17_s20 = sadd.s32 1, %s782_s20  }
 0x1ad   : > { %p14_p4 = scmp.ge.s32.totalorder %s17_s20, 4  }
 0x1af   :  { %16 = sbr.rel (!%p14_p4) target bundleno = 3 (0x3), region = 70 }

</bundles_post_ra>
